<compile_context>
chip_gen: v7x
topology: tpu7x:2x2x1
jax: 0.10.0
libtpu: 0.0.40
codegen_flags: <defaults>
</compile_context>

<pallas_src>
import jax
import jax.numpy as jnp
from jax.experimental import pallas as pl
from jax.experimental.pallas import tpu as pltpu


OUT_PAD = 128  # lane-dense head width; the real fc2 output lives in column 0


def _lstm_model_kernel(x_ref, wih_ref, whh_ref, b_ref, ps_ref, po_ref,
                       w1_ref, b1_ref, w2_ref, b2_ref,
                       out_ref, xg_scr):
    TB = x_ref.shape[0]
    H = whh_ref.shape[0]
    B = out_ref.shape[0]
    T = TB // B

    # --- Input projection for ALL timesteps: one MXU matmul, bias folded in.
    #     Keeps the only per-step matmul on the recurrence the h @ W_hh one.
    xg_scr[...] = (
        jnp.dot(x_ref[...], wih_ref[...], preferred_element_type=jnp.float32)
        + b_ref[...])

    # Loop-invariant post-affine constants for the gate nonlinearities.
    ps = ps_ref[...]   # (1, 4H): 0.5 on f/i/o columns, 1.0 on g columns
    po = po_ref[...]   # (1, 4H): 0.5 on f/i/o columns, 0.0 on g columns

    def activate(gates):
        # Columns are [f, i, o, g].  The 0.5 pre-scale of
        # sigmoid(x) = 0.5*tanh(0.5*x) + 0.5 is already folded into the
        # f/i/o weight columns, so ONE tanh over the whole (B, 4H) tile gives
        # every nonlinearity; the affine below finishes the sigmoids and is a
        # no-op (scale 1, offset 0) on the g columns.
        t = jnp.tanh(gates)
        act = t * ps + po
        f = act[:, 0 * H:1 * H]
        i = act[:, 1 * H:2 * H]
        o = act[:, 2 * H:3 * H]
        g = act[:, 3 * H:4 * H]
        return f, i, o, g

    # --- Peeled t = 0 step: h0 = c0 = 0 (nn.LSTM default), so there is no
    #     h @ W_hh matmul and the f*c term vanishes.
    f0, i0, o0, g0 = activate(xg_scr[pl.ds(0, B), :])
    c1 = i0 * g0
    h1 = o0 * jnp.tanh(c1)

    def step(t, carry):
        h, c = carry
        r = pl.multiple_of(t * B, B)        # B == 8 -> sublane-aligned slice
        xg_t = xg_scr[pl.ds(r, B), :]       # (B, 4H) precomputed x-projection
        # Re-load W_hh^T from VMEM each unrolled iteration: vld slots are idle
        # in this latency-bound kernel, and pinning (H,4H) f32 in vregs across
        # the unrolled body would risk spills.
        gates = xg_t + jnp.dot(h, whh_ref[...],
                               preferred_element_type=jnp.float32)
        f, i, o, g = activate(gates)
        c_new = f * c + i * g               # [f|i] * [c|g]: lane-aligned halves
        h_new = o * jnp.tanh(c_new)
        return h_new, c_new

    h_fin, _ = jax.lax.fori_loop(1, T, step, (h1, c1), unroll=True)

    # --- Head: fc1 -> ReLU -> fc2 on the final hidden state.  Everything is
    #     padded so the intermediate and the final store are full lane-dense
    #     (B, 128) tiles; b2 is a scalar read from SMEM.
    z1 = jnp.dot(h_fin, w1_ref[...], preferred_element_type=jnp.float32) + b1_ref[...]
    z1 = jnp.maximum(z1, 0.0)
    z2 = jnp.dot(z1, w2_ref[...], preferred_element_type=jnp.float32) + b2_ref[0]
    out_ref[...] = z2.astype(out_ref.dtype)


def lstm_model_forward(x_btI, kp):
    """x_btI: (B, T, I) float32, batch-first like the PyTorch module."""
    B, T, I = x_btI.shape
    H = kp["whh_t"].shape[0]

    # Layout plumbing only (no compute in the wrapper): time-major flat
    # (T*B, I) so the kernel does the whole input projection in one matmul and
    # reads timestep t as the contiguous rows [t*B, (t+1)*B).
    x_tb = jnp.transpose(x_btI, (1, 0, 2)).reshape(T * B, I)

    vmem = lambda: pl.BlockSpec(memory_space=pltpu.MemorySpace.VMEM)
    smem = lambda: pl.BlockSpec(memory_space=pltpu.MemorySpace.SMEM)

    out_pad = pl.pallas_call(
        _lstm_model_kernel,
        out_shape=jax.ShapeDtypeStruct((B, OUT_PAD), jnp.float32),
        in_specs=[vmem(),   # x (T*B, I)
                  vmem(),   # W_ih^T (I, 4H)   [f,i,o,g] cols, f/i/o pre-scaled
                  vmem(),   # W_hh^T (H, 4H)   [f,i,o,g] cols, f/i/o pre-scaled
                  vmem(),   # b = b_ih + b_hh (1, 4H), same scaling
                  vmem(),   # post_scale  (1, 4H)
                  vmem(),   # post_offset (1, 4H)
                  vmem(),   # W1^T padded (H, 128)
                  vmem(),   # b1 padded (1, 128)
                  vmem(),   # W2 padded (128, 128)
                  smem()],  # b2 scalar (1,)
        out_specs=vmem(),
        scratch_shapes=[pltpu.VMEM((T * B, 4 * H), jnp.float32)],  # xg buffer
        # No grid: the sequential recurrence lives entirely inside the kernel.
    )(x_tb, kp["wih_t"], kp["whh_t"], kp["b"],
      kp["post_scale"], kp["post_offset"],
      kp["w1_t"], kp["b1"], kp["w2_pad"], kp["b2"])

    return out_pad[:, :1]   # real fc2 output is column 0


def init_torch_params(key, input_size, hidden_size):
    """PyTorch-style weights: uniform(-1/sqrt(fan), 1/sqrt(fan)), gate order [i,f,g,o]."""
    H = hidden_size
    ks = jax.random.split(key, 8)
    u = lambda k, shape, scale: jax.random.uniform(k, shape, jnp.float32, -scale, scale)

    s = 1.0 / jnp.sqrt(jnp.float32(H))
    w_ih = u(ks[0], (4 * H, input_size), s)   # rows: [i, f, g, o]
    w_hh = u(ks[1], (4 * H, H), s)
    b_ih = u(ks[2], (4 * H,), s)
    b_hh = u(ks[3], (4 * H,), s)

    s1 = 1.0 / jnp.sqrt(jnp.float32(H))
    w1 = u(ks[4], (32, H), s1)
    b1 = u(ks[5], (32,), s1)
    s2 = 1.0 / jnp.sqrt(jnp.float32(32))
    w2 = u(ks[6], (1, 32), s2)
    b2 = u(ks[7], (1,), s2)

    return {"w_ih": w_ih, "w_hh": w_hh, "b_ih": b_ih, "b_hh": b_hh,
            "w1": w1, "b1": b1, "w2": w2, "b2": b2}


def prep_kernel_params(raw, hidden_size):
    """Host-side, zero-runtime-cost prep: gate reorder + sigmoid pre-scale fold + padding."""
    H = hidden_size

    # PyTorch gate order [i, f, g, o] -> kernel order [f, i, o, g] so that at
    # H=64 vreg0 = [f|i] and vreg1 = [o|g].
    perm = jnp.concatenate([
        jnp.arange(1 * H, 2 * H),   # f
        jnp.arange(0 * H, 1 * H),   # i
        jnp.arange(3 * H, 4 * H),   # o
        jnp.arange(2 * H, 3 * H),   # g
    ])
    w_ih = raw["w_ih"][perm]                      # (4H, I)
    w_hh = raw["w_hh"][perm]                      # (4H, H)
    b = (raw["b_ih"] + raw["b_hh"])[perm]         # (4H,)

    # Fold the 0.5 pre-scale of sigmoid(x) = 0.5*tanh(0.5*x) + 0.5 into the
    # f/i/o gate rows; g rows stay unscaled (plain tanh).
    pre = jnp.concatenate(
        [jnp.full((3 * H,), 0.5), jnp.ones((H,))]).astype(jnp.float32)
    w_ih = w_ih * pre[:, None]
    w_hh = w_hh * pre[:, None]
    b = b * pre

    post_scale = pre.reshape(1, 4 * H)                         # 0.5|0.5|0.5|1
    post_offset = jnp.concatenate(
        [jnp.full((3 * H,), 0.5), jnp.zeros((H,))]
    ).astype(jnp.float32).reshape(1, 4 * H)                    # 0.5|0.5|0.5|0

    # Lane-dense head: pad fc1/fc2 to 128 columns (zeros are exact).
    w1_t = jnp.zeros((H, OUT_PAD), jnp.float32).at[:, :32].set(raw["w1"].T)
    b1 = jnp.zeros((1, OUT_PAD), jnp.float32).at[:, :32].set(raw["b1"])
    w2_pad = jnp.zeros((OUT_PAD, OUT_PAD), jnp.float32).at[:32, :1].set(raw["w2"].T)

    return {
        "wih_t": w_ih.T,                 # (I, 4H)
        "whh_t": w_hh.T,                 # (H, 4H)
        "b": b.reshape(1, 4 * H),        # (1, 4H)
        "post_scale": post_scale,        # (1, 4H)
        "post_offset": post_offset,      # (1, 4H)
        "w1_t": w1_t,                    # (H, 128)
        "b1": b1,                        # (1, 128)
        "w2_pad": w2_pad,                # (128, 128)
        "b2": raw["b2"].astype(jnp.float32),  # (1,) SMEM scalar
    }


def _reference_forward(x, raw, hidden_size):
    """Pure-JAX reference of the PyTorch forward (raw weights, [i,f,g,o] order)."""
    H = hidden_size
    B, T, I = x.shape
    wih_t = raw["w_ih"].T
    whh_t = raw["w_hh"].T
    b = (raw["b_ih"] + raw["b_hh"]).reshape(1, 4 * H)
    h = jnp.zeros((B, H), jnp.float32)
    c = jnp.zeros((B, H), jnp.float32)
    for t in range(T):
        g = x[:, t, :] @ wih_t + h @ whh_t + b
        i = jax.nn.sigmoid(g[:, 0 * H:1 * H])
        f = jax.nn.sigmoid(g[:, 1 * H:2 * H])
        gg = jnp.tanh(g[:, 2 * H:3 * H])
        o = jax.nn.sigmoid(g[:, 3 * H:4 * H])
        c = f * c + i * gg
        h = o * jnp.tanh(c)
    z = jnp.maximum(h @ raw["w1"].T + raw["b1"], 0.0)
    return z @ raw["w2"].T + raw["b2"]


if __name__ == "__main__":
    # hidden_size=64 matches the module default; B=8 keeps per-step slices
    # sublane-aligned (f32 sublane = 8).
    B, T, I, H = 8, 8, 16, 64

    key = jax.random.PRNGKey(0)
    kx, kparam = jax.random.split(key)
    x = jax.random.normal(kx, (B, T, I), jnp.float32)

    raw = init_torch_params(kparam, input_size=I, hidden_size=H)
    kparams = prep_kernel_params(raw, hidden_size=H)

    out = lstm_model_forward(x, kparams)
    out = jax.block_until_ready(out)

    ref = _reference_forward(x, raw, hidden_size=H)
    assert out.shape == (B, 1)
    assert jnp.allclose(out, ref, atol=1e-4, rtol=1e-4), (out, ref)

    print("KERNEL_OK")
</pallas_src>

<mosaic_0001>
module attributes {stable_mosaic.version = 11 : i64} {
  func.func @_lstm_model_kernel(%arg0: memref<64x16xf32, #tpu.memory_space<vmem>>, %arg1: memref<16x256xf32, #tpu.memory_space<vmem>>, %arg2: memref<64x256xf32, #tpu.memory_space<vmem>>, %arg3: memref<1x256xf32, #tpu.memory_space<vmem>>, %arg4: memref<1x256xf32, #tpu.memory_space<vmem>>, %arg5: memref<1x256xf32, #tpu.memory_space<vmem>>, %arg6: memref<64x128xf32, #tpu.memory_space<vmem>>, %arg7: memref<1x128xf32, #tpu.memory_space<vmem>>, %arg8: memref<128x128xf32, #tpu.memory_space<vmem>>, %arg9: memref<1xf32, #tpu.memory_space<smem>>, %arg10: memref<8x128xf32, #tpu.memory_space<vmem>>, %arg11: memref<64x256xf32, #tpu.memory_space<vmem>>) attributes {dimension_semantics = [], scalar_prefetch = 0 : i64, scratch_operands = 1 : i64, tpu.core_type = #tpu.core_type<tc>} {
    %c0 = arith.constant 0 : index
    %c0_0 = arith.constant 0 : index
    %0 = vector.load %arg0[%c0, %c0_0] : memref<64x16xf32, #tpu.memory_space<vmem>>, vector<64x16xf32>
    %c0_1 = arith.constant 0 : index
    %c0_2 = arith.constant 0 : index
    %1 = vector.load %arg1[%c0_1, %c0_2] : memref<16x256xf32, #tpu.memory_space<vmem>>, vector<16x256xf32>
    %cst = arith.constant dense<0.000000e+00> : vector<64x256xf32>
    %2 = tpu.matmul %0, %1, %cst {dimension_numbers = #tpu.dot_dimension_numbers<[1], [0], [0], [1], [0, 0, 1, 1], [], []>} : vector<64x16xf32>, vector<16x256xf32>, vector<64x256xf32> -> vector<64x256xf32>
    %c0_3 = arith.constant 0 : index
    %c0_4 = arith.constant 0 : index
    %3 = vector.load %arg3[%c0_3, %c0_4] : memref<1x256xf32, #tpu.memory_space<vmem>>, vector<1x256xf32>
    %4 = vector.broadcast %3 : vector<1x256xf32> to vector<64x256xf32>
    %5 = arith.addf %2, %4 : vector<64x256xf32>
    %c0_5 = arith.constant 0 : index
    %c0_6 = arith.constant 0 : index
    %6 = vector.load %arg11[%c0_5, %c0_6] : memref<64x256xf32, #tpu.memory_space<vmem>>, vector<64x256xf32>
    tpu.vector_store %arg11[%c0_5, %c0_6], %5 {strides = array<i32>} : memref<64x256xf32, #tpu.memory_space<vmem>>, vector<64x256xf32>,
    %c0_7 = arith.constant 0 : index
    %c0_8 = arith.constant 0 : index
    %7 = vector.load %arg4[%c0_7, %c0_8] : memref<1x256xf32, #tpu.memory_space<vmem>>, vector<1x256xf32>
    %c0_9 = arith.constant 0 : index
    %c0_10 = arith.constant 0 : index
    %8 = vector.load %arg5[%c0_9, %c0_10] : memref<1x256xf32, #tpu.memory_space<vmem>>, vector<1x256xf32>
    %c0_11 = arith.constant 0 : index
    %c0_12 = arith.constant 0 : index
    %9 = vector.load %arg11[%c0_11, %c0_12] : memref<64x256xf32, #tpu.memory_space<vmem>>, vector<8x256xf32>
    %10 = math.tanh %9 : vector<8x256xf32>
    %11 = vector.broadcast %7 : vector<1x256xf32> to vector<8x256xf32>
    %12 = arith.mulf %10, %11 : vector<8x256xf32>
    %13 = vector.broadcast %8 : vector<1x256xf32> to vector<8x256xf32>
    %14 = arith.addf %12, %13 : vector<8x256xf32>
    %15 = vector.extract_strided_slice %14 {offsets = [0, 64], sizes = [8, 64], strides = [1, 1]} : vector<8x256xf32> to vector<8x64xf32>
    %16 = vector.extract_strided_slice %14 {offsets = [0, 128], sizes = [8, 64], strides = [1, 1]} : vector<8x256xf32> to vector<8x64xf32>
    %17 = vector.extract_strided_slice %14 {offsets = [0, 192], sizes = [8, 64], strides = [1, 1]} : vector<8x256xf32> to vector<8x64xf32>
    %18 = arith.mulf %15, %17 : vector<8x64xf32>
    %19 = math.tanh %18 : vector<8x64xf32>
    %20 = arith.mulf %16, %19 : vector<8x64xf32>
    %c1_i32 = arith.constant 1 : i32
    %c8_i32 = arith.constant 8 : i32
    %21 = arith.muli %c1_i32, %c8_i32 : i32
    %22 = tpu.assume_multiple %21, 8 : i32
    %23 = arith.index_cast %22 : i32 to index
    %c0_13 = arith.constant 0 : index
    %24 = vector.load %arg11[%23, %c0_13] : memref<64x256xf32, #tpu.memory_space<vmem>>, vector<8x256xf32>
    %c0_14 = arith.constant 0 : index
    %c0_15 = arith.constant 0 : index
    %25 = vector.load %arg2[%c0_14, %c0_15] : memref<64x256xf32, #tpu.memory_space<vmem>>, vector<64x256xf32>
    %cst_16 = arith.constant dense<0.000000e+00> : vector<8x256xf32>
    %26 = tpu.matmul %20, %25, %cst_16 {dimension_numbers = #tpu.dot_dimension_numbers<[1], [0], [0], [1], [0, 0, 1, 1], [], []>} : vector<8x64xf32>, vector<64x256xf32>, vector<8x256xf32> -> vector<8x256xf32>
    %27 = arith.addf %24, %26 : vector<8x256xf32>
    %28 = math.tanh %27 : vector<8x256xf32>
    %29 = vector.broadcast %7 : vector<1x256xf32> to vector<8x256xf32>
    %30 = arith.mulf %28, %29 : vector<8x256xf32>
    %31 = vector.broadcast %8 : vector<1x256xf32> to vector<8x256xf32>
    %32 = arith.addf %30, %31 : vector<8x256xf32>
    %33 = vector.extract_strided_slice %32 {offsets = [0, 0], sizes = [8, 64], strides = [1, 1]} : vector<8x256xf32> to vector<8x64xf32>
    %34 = vector.extract_strided_slice %32 {offsets = [0, 64], sizes = [8, 64], strides = [1, 1]} : vector<8x256xf32> to vector<8x64xf32>
    %35 = vector.extract_strided_slice %32 {offsets = [0, 128], sizes = [8, 64], strides = [1, 1]} : vector<8x256xf32> to vector<8x64xf32>
    %36 = vector.extract_strided_slice %32 {offsets = [0, 192], sizes = [8, 64], strides = [1, 1]} : vector<8x256xf32> to vector<8x64xf32>
    %37 = arith.mulf %33, %18 : vector<8x64xf32>
    %38 = arith.mulf %34, %36 : vector<8x64xf32>
    %39 = arith.addf %37, %38 : vector<8x64xf32>
    %40 = math.tanh %39 : vector<8x64xf32>
    %41 = arith.mulf %35, %40 : vector<8x64xf32>
    %c2_i32 = arith.constant 2 : i32
    %c8_i32_17 = arith.constant 8 : i32
    %42 = arith.muli %c2_i32, %c8_i32_17 : i32
    %43 = tpu.assume_multiple %42, 8 : i32
    %44 = arith.index_cast %43 : i32 to index
    %c0_18 = arith.constant 0 : index
    %45 = vector.load %arg11[%44, %c0_18] : memref<64x256xf32, #tpu.memory_space<vmem>>, vector<8x256xf32>
    %c0_19 = arith.constant 0 : index
    %c0_20 = arith.constant 0 : index
    %46 = vector.load %arg2[%c0_19, %c0_20] : memref<64x256xf32, #tpu.memory_space<vmem>>, vector<64x256xf32>
    %cst_21 = arith.constant dense<0.000000e+00> : vector<8x256xf32>
    %47 = tpu.matmul %41, %46, %cst_21 {dimension_numbers = #tpu.dot_dimension_numbers<[1], [0], [0], [1], [0, 0, 1, 1], [], []>} : vector<8x64xf32>, vector<64x256xf32>, vector<8x256xf32> -> vector<8x256xf32>
    %48 = arith.addf %45, %47 : vector<8x256xf32>
    %49 = math.tanh %48 : vector<8x256xf32>
    %50 = vector.broadcast %7 : vector<1x256xf32> to vector<8x256xf32>
    %51 = arith.mulf %49, %50 : vector<8x256xf32>
    %52 = vector.broadcast %8 : vector<1x256xf32> to vector<8x256xf32>
    %53 = arith.addf %51, %52 : vector<8x256xf32>
    %54 = vector.extract_strided_slice %53 {offsets = [0, 0], sizes = [8, 64], strides = [1, 1]} : vector<8x256xf32> to vector<8x64xf32>
    %55 = vector.extract_strided_slice %53 {offsets = [0, 64], sizes = [8, 64], strides = [1, 1]} : vector<8x256xf32> to vector<8x64xf32>
    %56 = vector.extract_strided_slice %53 {offsets = [0, 128], sizes = [8, 64], strides = [1, 1]} : vector<8x256xf32> to vector<8x64xf32>
    %57 = vector.extract_strided_slice %53 {offsets = [0, 192], sizes = [8, 64], strides = [1, 1]} : vector<8x256xf32> to vector<8x64xf32>
    %58 = arith.mulf %54, %39 : vector<8x64xf32>
    %59 = arith.mulf %55, %57 : vector<8x64xf32>
    %60 = arith.addf %58, %59 : vector<8x64xf32>
    %61 = math.tanh %60 : vector<8x64xf32>
    %62 = arith.mulf %56, %61 : vector<8x64xf32>
    %c3_i32 = arith.constant 3 : i32
    %c8_i32_22 = arith.constant 8 : i32
    %63 = arith.muli %c3_i32, %c8_i32_22 : i32
    %64 = tpu.assume_multiple %63, 8 : i32
    %65 = arith.index_cast %64 : i32 to index
    %c0_23 = arith.constant 0 : index
    %66 = vector.load %arg11[%65, %c0_23] : memref<64x256xf32, #tpu.memory_space<vmem>>, vector<8x256xf32>
    %c0_24 = arith.constant 0 : index
    %c0_25 = arith.constant 0 : index
    %67 = vector.load %arg2[%c0_24, %c0_25] : memref<64x256xf32, #tpu.memory_space<vmem>>, vector<64x256xf32>
    %cst_26 = arith.constant dense<0.000000e+00> : vector<8x256xf32>
    %68 = tpu.matmul %62, %67, %cst_26 {dimension_numbers = #tpu.dot_dimension_numbers<[1], [0], [0], [1], [0, 0, 1, 1], [], []>} : vector<8x64xf32>, vector<64x256xf32>, vector<8x256xf32> -> vector<8x256xf32>
    %69 = arith.addf %66, %68 : vector<8x256xf32>
    %70 = math.tanh %69 : vector<8x256xf32>
    %71 = vector.broadcast %7 : vector<1x256xf32> to vector<8x256xf32>
    %72 = arith.mulf %70, %71 : vector<8x256xf32>
    %73 = vector.broadcast %8 : vector<1x256xf32> to vector<8x256xf32>
    %74 = arith.addf %72, %73 : vector<8x256xf32>
    %75 = vector.extract_strided_slice %74 {offsets = [0, 0], sizes = [8, 64], strides = [1, 1]} : vector<8x256xf32> to vector<8x64xf32>
    %76 = vector.extract_strided_slice %74 {offsets = [0, 64], sizes = [8, 64], strides = [1, 1]} : vector<8x256xf32> to vector<8x64xf32>
    %77 = vector.extract_strided_slice %74 {offsets = [0, 128], sizes = [8, 64], strides = [1, 1]} : vector<8x256xf32> to vector<8x64xf32>
    %78 = vector.extract_strided_slice %74 {offsets = [0, 192], sizes = [8, 64], strides = [1, 1]} : vector<8x256xf32> to vector<8x64xf32>
    %79 = arith.mulf %75, %60 : vector<8x64xf32>
    %80 = arith.mulf %76, %78 : vector<8x64xf32>
    %81 = arith.addf %79, %80 : vector<8x64xf32>
    %82 = math.tanh %81 : vector<8x64xf32>
    %83 = arith.mulf %77, %82 : vector<8x64xf32>
    %c4_i32 = arith.constant 4 : i32
    %c8_i32_27 = arith.constant 8 : i32
    %84 = arith.muli %c4_i32, %c8_i32_27 : i32
    %85 = tpu.assume_multiple %84, 8 : i32
    %86 = arith.index_cast %85 : i32 to index
    %c0_28 = arith.constant 0 : index
    %87 = vector.load %arg11[%86, %c0_28] : memref<64x256xf32, #tpu.memory_space<vmem>>, vector<8x256xf32>
    %c0_29 = arith.constant 0 : index
    %c0_30 = arith.constant 0 : index
    %88 = vector.load %arg2[%c0_29, %c0_30] : memref<64x256xf32, #tpu.memory_space<vmem>>, vector<64x256xf32>
    %cst_31 = arith.constant dense<0.000000e+00> : vector<8x256xf32>
    %89 = tpu.matmul %83, %88, %cst_31 {dimension_numbers = #tpu.dot_dimension_numbers<[1], [0], [0], [1], [0, 0, 1, 1], [], []>} : vector<8x64xf32>, vector<64x256xf32>, vector<8x256xf32> -> vector<8x256xf32>
    %90 = arith.addf %87, %89 : vector<8x256xf32>
    %91 = math.tanh %90 : vector<8x256xf32>
    %92 = vector.broadcast %7 : vector<1x256xf32> to vector<8x256xf32>
    %93 = arith.mulf %91, %92 : vector<8x256xf32>
    %94 = vector.broadcast %8 : vector<1x256xf32> to vector<8x256xf32>
    %95 = arith.addf %93, %94 : vector<8x256xf32>
    %96 = vector.extract_strided_slice %95 {offsets = [0, 0], sizes = [8, 64], strides = [1, 1]} : vector<8x256xf32> to vector<8x64xf32>
    %97 = vector.extract_strided_slice %95 {offsets = [0, 64], sizes = [8, 64], strides = [1, 1]} : vector<8x256xf32> to vector<8x64xf32>
    %98 = vector.extract_strided_slice %95 {offsets = [0, 128], sizes = [8, 64], strides = [1, 1]} : vector<8x256xf32> to vector<8x64xf32>
    %99 = vector.extract_strided_slice %95 {offsets = [0, 192], sizes = [8, 64], strides = [1, 1]} : vector<8x256xf32> to vector<8x64xf32>
    %100 = arith.mulf %96, %81 : vector<8x64xf32>
    %101 = arith.mulf %97, %99 : vector<8x64xf32>
    %102 = arith.addf %100, %101 : vector<8x64xf32>
    %103 = math.tanh %102 : vector<8x64xf32>
    %104 = arith.mulf %98, %103 : vector<8x64xf32>
    %c5_i32 = arith.constant 5 : i32
    %c8_i32_32 = arith.constant 8 : i32
    %105 = arith.muli %c5_i32, %c8_i32_32 : i32
    %106 = tpu.assume_multiple %105, 8 : i32
    %107 = arith.index_cast %106 : i32 to index
    %c0_33 = arith.constant 0 : index
    %108 = vector.load %arg11[%107, %c0_33] : memref<64x256xf32, #tpu.memory_space<vmem>>, vector<8x256xf32>
    %c0_34 = arith.constant 0 : index
    %c0_35 = arith.constant 0 : index
    %109 = vector.load %arg2[%c0_34, %c0_35] : memref<64x256xf32, #tpu.memory_space<vmem>>, vector<64x256xf32>
    %cst_36 = arith.constant dense<0.000000e+00> : vector<8x256xf32>
    %110 = tpu.matmul %104, %109, %cst_36 {dimension_numbers = #tpu.dot_dimension_numbers<[1], [0], [0], [1], [0, 0, 1, 1], [], []>} : vector<8x64xf32>, vector<64x256xf32>, vector<8x256xf32> -> vector<8x256xf32>
    %111 = arith.addf %108, %110 : vector<8x256xf32>
    %112 = math.tanh %111 : vector<8x256xf32>
    %113 = vector.broadcast %7 : vector<1x256xf32> to vector<8x256xf32>
    %114 = arith.mulf %112, %113 : vector<8x256xf32>
    %115 = vector.broadcast %8 : vector<1x256xf32> to vector<8x256xf32>
    %116 = arith.addf %114, %115 : vector<8x256xf32>
    %117 = vector.extract_strided_slice %116 {offsets = [0, 0], sizes = [8, 64], strides = [1, 1]} : vector<8x256xf32> to vector<8x64xf32>
    %118 = vector.extract_strided_slice %116 {offsets = [0, 64], sizes = [8, 64], strides = [1, 1]} : vector<8x256xf32> to vector<8x64xf32>
    %119 = vector.extract_strided_slice %116 {offsets = [0, 128], sizes = [8, 64], strides = [1, 1]} : vector<8x256xf32> to vector<8x64xf32>
    %120 = vector.extract_strided_slice %116 {offsets = [0, 192], sizes = [8, 64], strides = [1, 1]} : vector<8x256xf32> to vector<8x64xf32>
    %121 = arith.mulf %117, %102 : vector<8x64xf32>
    %122 = arith.mulf %118, %120 : vector<8x64xf32>
    %123 = arith.addf %121, %122 : vector<8x64xf32>
    %124 = math.tanh %123 : vector<8x64xf32>
    %125 = arith.mulf %119, %124 : vector<8x64xf32>
    %c6_i32 = arith.constant 6 : i32
    %c8_i32_37 = arith.constant 8 : i32
    %126 = arith.muli %c6_i32, %c8_i32_37 : i32
    %127 = tpu.assume_multiple %126, 8 : i32
    %128 = arith.index_cast %127 : i32 to index
    %c0_38 = arith.constant 0 : index
    %129 = vector.load %arg11[%128, %c0_38] : memref<64x256xf32, #tpu.memory_space<vmem>>, vector<8x256xf32>
    %c0_39 = arith.constant 0 : index
    %c0_40 = arith.constant 0 : index
    %130 = vector.load %arg2[%c0_39, %c0_40] : memref<64x256xf32, #tpu.memory_space<vmem>>, vector<64x256xf32>
    %cst_41 = arith.constant dense<0.000000e+00> : vector<8x256xf32>
    %131 = tpu.matmul %125, %130, %cst_41 {dimension_numbers = #tpu.dot_dimension_numbers<[1], [0], [0], [1], [0, 0, 1, 1], [], []>} : vector<8x64xf32>, vector<64x256xf32>, vector<8x256xf32> -> vector<8x256xf32>
    %132 = arith.addf %129, %131 : vector<8x256xf32>
    %133 = math.tanh %132 : vector<8x256xf32>
    %134 = vector.broadcast %7 : vector<1x256xf32> to vector<8x256xf32>
    %135 = arith.mulf %133, %134 : vector<8x256xf32>
    %136 = vector.broadcast %8 : vector<1x256xf32> to vector<8x256xf32>
    %137 = arith.addf %135, %136 : vector<8x256xf32>
    %138 = vector.extract_strided_slice %137 {offsets = [0, 0], sizes = [8, 64], strides = [1, 1]} : vector<8x256xf32> to vector<8x64xf32>
    %139 = vector.extract_strided_slice %137 {offsets = [0, 64], sizes = [8, 64], strides = [1, 1]} : vector<8x256xf32> to vector<8x64xf32>
    %140 = vector.extract_strided_slice %137 {offsets = [0, 128], sizes = [8, 64], strides = [1, 1]} : vector<8x256xf32> to vector<8x64xf32>
    %141 = vector.extract_strided_slice %137 {offsets = [0, 192], sizes = [8, 64], strides = [1, 1]} : vector<8x256xf32> to vector<8x64xf32>
    %142 = arith.mulf %138, %123 : vector<8x64xf32>
    %143 = arith.mulf %139, %141 : vector<8x64xf32>
    %144 = arith.addf %142, %143 : vector<8x64xf32>
    %145 = math.tanh %144 : vector<8x64xf32>
    %146 = arith.mulf %140, %145 : vector<8x64xf32>
    %c7_i32 = arith.constant 7 : i32
    %c8_i32_42 = arith.constant 8 : i32
    %147 = arith.muli %c7_i32, %c8_i32_42 : i32
    %148 = tpu.assume_multiple %147, 8 : i32
    %149 = arith.index_cast %148 : i32 to index
    %c0_43 = arith.constant 0 : index
    %150 = vector.load %arg11[%149, %c0_43] : memref<64x256xf32, #tpu.memory_space<vmem>>, vector<8x256xf32>
    %c0_44 = arith.constant 0 : index
    %c0_45 = arith.constant 0 : index
    %151 = vector.load %arg2[%c0_44, %c0_45] : memref<64x256xf32, #tpu.memory_space<vmem>>, vector<64x256xf32>
    %cst_46 = arith.constant dense<0.000000e+00> : vector<8x256xf32>
    %152 = tpu.matmul %146, %151, %cst_46 {dimension_numbers = #tpu.dot_dimension_numbers<[1], [0], [0], [1], [0, 0, 1, 1], [], []>} : vector<8x64xf32>, vector<64x256xf32>, vector<8x256xf32> -> vector<8x256xf32>
    %153 = arith.addf %150, %152 : vector<8x256xf32>
    %154 = math.tanh %153 : vector<8x256xf32>
    %155 = vector.broadcast %7 : vector<1x256xf32> to vector<8x256xf32>
    %156 = arith.mulf %154, %155 : vector<8x256xf32>
    %157 = vector.broadcast %8 : vector<1x256xf32> to vector<8x256xf32>
    %158 = arith.addf %156, %157 : vector<8x256xf32>
    %159 = vector.extract_strided_slice %158 {offsets = [0, 0], sizes = [8, 64], strides = [1, 1]} : vector<8x256xf32> to vector<8x64xf32>
    %160 = vector.extract_strided_slice %158 {offsets = [0, 64], sizes = [8, 64], strides = [1, 1]} : vector<8x256xf32> to vector<8x64xf32>
    %161 = vector.extract_strided_slice %158 {offsets = [0, 128], sizes = [8, 64], strides = [1, 1]} : vector<8x256xf32> to vector<8x64xf32>
    %162 = vector.extract_strided_slice %158 {offsets = [0, 192], sizes = [8, 64], strides = [1, 1]} : vector<8x256xf32> to vector<8x64xf32>
    %163 = arith.mulf %159, %144 : vector<8x64xf32>
    %164 = arith.mulf %160, %162 : vector<8x64xf32>
    %165 = arith.addf %163, %164 : vector<8x64xf32>
    %166 = math.tanh %165 : vector<8x64xf32>
    %167 = arith.mulf %161, %166 : vector<8x64xf32>
    %c7_i32_47 = arith.constant 7 : i32
    %c0_48 = arith.constant 0 : index
    %c0_49 = arith.constant 0 : index
    %168 = vector.load %arg6[%c0_48, %c0_49] : memref<64x128xf32, #tpu.memory_space<vmem>>, vector<64x128xf32>
    %cst_50 = arith.constant dense<0.000000e+00> : vector<8x128xf32>
    %169 = tpu.matmul %167, %168, %cst_50 {dimension_numbers = #tpu.dot_dimension_numbers<[1], [0], [0], [1], [0, 0, 1, 1], [], []>} : vector<8x64xf32>, vector<64x128xf32>, vector<8x128xf32> -> vector<8x128xf32>
    %c0_51 = arith.constant 0 : index
    %c0_52 = arith.constant 0 : index
    %170 = vector.load %arg7[%c0_51, %c0_52] : memref<1x128xf32, #tpu.memory_space<vmem>>, vector<1x128xf32>
    %171 = vector.broadcast %170 : vector<1x128xf32> to vector<8x128xf32>
    %172 = arith.addf %169, %171 : vector<8x128xf32>
    %cst_53 = arith.constant 0.000000e+00 : f32
    %173 = vector.broadcast %cst_53 : f32 to vector<8x128xf32>
    %174 = arith.maximumf %172, %173 : vector<8x128xf32>
    %c0_54 = arith.constant 0 : index
    %c0_55 = arith.constant 0 : index
    %175 = vector.load %arg8[%c0_54, %c0_55] : memref<128x128xf32, #tpu.memory_space<vmem>>, vector<128x128xf32>
    %cst_56 = arith.constant dense<0.000000e+00> : vector<8x128xf32>
    %176 = tpu.matmul %174, %175, %cst_56 {dimension_numbers = #tpu.dot_dimension_numbers<[1], [0], [0], [1], [0, 0, 1, 1], [], []>} : vector<8x128xf32>, vector<128x128xf32>, vector<8x128xf32> -> vector<8x128xf32>
    %c0_57 = arith.constant 0 : index
    %177 = memref.load %arg9[%c0_57] : memref<1xf32, #tpu.memory_space<smem>>
    %178 = vector.broadcast %177 : f32 to vector<8x128xf32>
    %179 = arith.addf %176, %178 : vector<8x128xf32>
    %c0_58 = arith.constant 0 : index
    %c0_59 = arith.constant 0 : index
    %180 = vector.load %arg10[%c0_58, %c0_59] : memref<8x128xf32, #tpu.memory_space<vmem>>, vector<8x128xf32>
    tpu.vector_store %arg10[%c0_58, %c0_59], %179 {strides = array<i32>} : memref<8x128xf32, #tpu.memory_space<vmem>>, vector<8x128xf32>,
    return
  }
}

</mosaic_0001>

<bundles_post_ra>
// kernel: tpu_custom_call.1
= control target key start
LH: loop header
LB: loop body
LE: loop exit
PB: predicated region body
PF: predicated region fallthrough
CT: control target
= control target key end

     0   :  { %16 = vsyncpa [#allocation5], 0  ;;  %s1979_s0 = inlined_call_operand.vmem [shape: f32[64,16], index: 0, kind: input, shape index: {}]   ;;  %s1980_s1 = inlined_call_operand.vmem [shape: f32[16,256], index: 1, kind: input, shape index: {}]   ;;  %s1981_s2 = inlined_call_operand.hbm [shape: f32[64,256], index: 2, kind: input, shape index: {}]   ;;  %s1982_s3 = inlined_call_operand.vmem [shape: f32[1,256], index: 3, kind: input, shape index: {}]   ;;  %s1983_s4 = inlined_call_operand.vmem [shape: f32[1,256], index: 4, kind: input, shape index: {}]   ;;  %s1984_s5 = inlined_call_operand.vmem [shape: f32[1,256], index: 5, kind: input, shape index: {}]   ;;  %s1985_s6 = inlined_call_operand.vmem [shape: f32[64,128], index: 6, kind: input, shape index: {}]   ;;  %s1986_s7 = inlined_call_operand.vmem [shape: f32[1,128], index: 7, kind: input, shape index: {}]   ;;  %s1987_s8 = inlined_call_operand.hbm [shape: f32[128,128], index: 8, kind: input, shape index: {}]   ;;  %s1988_s9 = inlined_call_operand.<no memory space> [shape: f32[1], index: 9, kind: input, shape index: {}]   ;;  %s1989_s10 = inlined_call_operand.hbm [shape: f32[8,128], index: 10, kind: output, shape index: {}]  }
   0x1   :  { %17 = vsyncpa [#allocation8], 0 }
   0x2   :  { %18 = vsyncpa [#allocation6], 0  ;;  %s1584_s13 = smov [#allocation4]   ;;  %s1512_s17 = scalar_lea.hbm %s1981_s2, 2048 }
   0x3   :  { %s28_s14 = sshll.u32 %s1584_s13, 4  ;;  %p1513_p0 = scmp.ne.s32.totalorder %s1981_s2, %s1512_s17  ;;  %s29_s14 = int_to_ptr.vmem [resolvable:$true] %s28_s14 }
   0x4   :  { %p1516_p1 = scmp.lt.u32.totalorder %s1512_s17, %s1981_s2 }
   0x6   :  { %p1518_p2 = pnand %p1516_p1, %p1513_p0 }
   0x8   :  { %1521 = shalt.err (!%p1518_p2)
}
   0x9   :  { %s1522_s22 = scalar_lea.vmem %s29_s14, 2048  ;;  %p1527_p4 = scmp.lt.s32.totalorder %s29_s14, %s29_s14 }
   0xa   :  { %p1523_p3 = scmp.ne.s32.totalorder %s29_s14, %s1522_s22  ;;  %p1528_p5 = scmp.lt.s32.totalorder %s1522_s22, %s1522_s22 }
   0xc   :  { %p1529_p6 = por %p1528_p5, %p1527_p4 }
   0xe   :  { %p1530_p7 = pnand %p1529_p6, %p1523_p3 }
  0x10   :  { %1533 = shalt.err (!%p1530_p7)
}
  0x11   :  { %s1585_s23 = smov 256   ;;  %s1586_s24 = smov 16  }
  0x12   :  { %34 = dma.hbm_to_vmem [thread:$0]  %s1981_s2, 2048, %s29_s14, [#allocation5], %s1585_s23, %s1585_s23, %s1586_s24  }
  0x13   :  { %s1587_s27 = smov [#allocation7]   ;;  %s1534_s11 = scalar_lea.hbm %s1987_s8, 2048 }
  0x14   :  { %s50_s28 = sshll.u32 %s1587_s27, 4  ;;  %p1535_p8 = scmp.ne.s32.totalorder %s1987_s8, %s1534_s11  ;;  %s51_s28 = int_to_ptr.vmem [resolvable:$true] %s50_s28 }
  0x15   :  { %p1538_p9 = scmp.lt.u32.totalorder %s1534_s11, %s1987_s8 }
  0x17   :  { %p1540_p10 = pnand %p1538_p9, %p1535_p8 }
  0x19   :  { %1543 = shalt.err (!%p1540_p10)
}
  0x1a   :  { %s1544_s17 = scalar_lea.vmem %s51_s28, 2048  ;;  %p1549_p12 = scmp.lt.s32.totalorder %s51_s28, %s51_s28 }
  0x1b   :  { %p1545_p11 = scmp.ne.s32.totalorder %s51_s28, %s1544_s17  ;;  %p1550_p13 = scmp.lt.s32.totalorder %s1544_s17, %s1544_s17 }
  0x1d   :  { %p1551_p0 = por %p1550_p13, %p1549_p12 }
  0x1f   :  { %p1552_p1 = pnand %p1551_p0, %p1545_p11 }
  0x21   :  { %1555 = shalt.err (!%p1552_p1)
}
  0x22   :  { %s1588_s2 = smov 128   ;;  %s1589_s14 = smov 8  }
  0x23   :  { %56 = dma.hbm_to_vmem [thread:$0]  %s1987_s8, 2048, %s51_s28, [#allocation8], %s1588_s2, %s1588_s2, %s1589_s14  }
  0x24   :  { %1578 = dma.done.wait [#allocation5], 2048  }
  0x25   :  { %1579 = vsyncadd [#allocation5], 4294965248 }
  0x26   :  { %1580 = dma.done.wait [#allocation8], 2048  }
  0x27   :  { %1581 = vsyncadd [#allocation8], 4294965248  ;;  %v1590_v0 = vmov 0.0   ;;  %v74_v1 = vld [vmem:[%s1980_s1 + $0x8] sm:$0xff]  ;;  %v76_v2 = vld [vmem:[%s1980_s1 + $0x18] sm:$0xff]  ;;  %vm89_vm0 = vcmask 130048   ;;  %v79_v39 = vlaneseq }
  0x28   :  { %178 = vmatprep.mubr.f32.mxu1 %v1590_v0  ;;  %471 = vmatprep.mubr.f32.mxu0 %v1590_v0  ;;  %v73_v3 = vld [vmem:[%s1980_s1] sm:$0xff]  ;;  %v1273_v4 = vpack.c.bf16 %v76_v2, %v74_v1  ;;  %v75_v5 = vld [vmem:[%s1980_s1 + $0x10] sm:$0xff]  ;;  %v288_v8 = vld [vmem:[#allocation4 + $0x8] sm:$0xff]  ;;  %vm303_vm1 = vcmask 523264   ;;  %vm1593_vm2 = vmmov 0   ;;  %s1594_s20 = smov [#allocation9]  }
  0x29   :  { %v1275_v6 = vpack.c.bf16 %v75_v5, %v73_v3  ;;  %v65_v7 = vld [vmem:[%s1979_s0] sm:$0xff]  ;;  %v290_v9 = vld [vmem:[#allocation4 + $0x18] sm:$0xff]  ;;  %v289_v12 = vld [vmem:[#allocation4 + $0x10] sm:$0xff]  ;;  %v80_v40 = vshrl.u32 %v79_v39, 7  ;;  %s1159_s21 = sshll.u32 %s1594_s20, 4  ;;  %s1160_s21 = int_to_ptr.vmem [resolvable:$true] %s1159_s21 }
  0x2a   :  { %1274 = vmatprep.subr.bf16.mxu1 %v1273_v4  ;;  %v287_v10 = vld [vmem:[#allocation4] sm:$0xff]  ;;  %v1693_v11 = vpack.c.bf16 %v290_v9, %v288_v8  ;;  %v66_v13 = vld [vmem:[%s1979_s0 + $0x8] sm:$0xff]  ;;  %v294_v16 = vld [vmem:[#allocation4 + $0x38] sm:$0xff]  ;;  %s1556_s22 = scalar_lea.vmem %s1160_s21, 128  ;;  %p1561_p3 = scmp.lt.s32.totalorder %s1160_s21, %s1160_s21 }
  0x2b   :  { %1276 = vmatpush1.bf16.msra.mxu1 %v1275_v6  ;;  %v1698_v14 = vpack.c.bf16 %v289_v12, %v287_v10  ;;  %v292_v15 = vld [vmem:[#allocation4 + $0x28] sm:$0xff]  ;;  %v291_v17 = vld [vmem:[#allocation4 + $0x20] sm:$0xff]  ;;  %v67_v18 = vld [vmem:[%s1979_s0 + $0x10] sm:$0xff]  ;;  %v81_v41 = vsub.s32 0, %v80_v40  ;;  %v85_v43 = vsub.s32 1, %v80_v40  ;;  %p1557_p2 = scmp.ne.s32.totalorder %s1160_s21, %s1556_s22  ;;  %p1562_p4 = scmp.lt.s32.totalorder %s1556_s22, %s1556_s22 }
  0x2c   :  { %1278 = vmatprep.subr.bf16.mxu1 %v1693_v11  ;;  %v1706_v19 = vpack.c.bf16 %v294_v16, %v292_v15  ;;  %v293_v20 = vld [vmem:[#allocation4 + $0x30] sm:$0xff]  ;;  %v296_v22 = vld [vmem:[#allocation4 + $0x48] sm:$0xff]  ;;  %v298_v23 = vld [vmem:[#allocation4 + $0x58] sm:$0xff]  ;;  %1294 = vmatprep.subr.bf16.mxu0 %v1693_v11 }
  0x2d   :  { %v1709_v21 = vpack.c.bf16 %v293_v20, %v291_v17  ;;  %v1713_v24 = vpack.c.bf16 %v298_v23, %v296_v22  ;;  %v295_v25 = vld [vmem:[#allocation4 + $0x40] sm:$0xff]  ;;  %v297_v26 = vld [vmem:[#allocation4 + $0x50] sm:$0xff]  ;;  %1296 = vmatpush1.bf16.msra.mxu0 %v1698_v14  ;;  %v300_v27 = vld [vmem:[#allocation4 + $0x68] sm:$0xff]  ;;  %p1563_p5 = por %p1562_p4, %p1561_p3 }
  0x2e   :  { %1176 = vmatmul.mubr.msk.f32.vlgmr.msra.gmra.mrb[0].mxu1 %vm89_vm0, %v65_v7  ;;  %v302_v28 = vld [vmem:[#allocation4 + $0x78] sm:$0xff]  ;;  %1298 = vmatprep.subr.bf16.mxu0 %v1706_v19  ;;  %v1723_v30 = vpack.c.bf16 %v297_v26, %v295_v25  ;;  %v299_v32 = vld [vmem:[#allocation4 + $0x60] sm:$0xff]  ;;  %v301_v33 = vld [vmem:[#allocation4 + $0x70] sm:$0xff] }
  0x2f   :  { %184 = vmatprep.mubr.f32.mxu1 %v1590_v0  ;;  %1280 = vmatpush1.bf16.msra.mxu1 %v1698_v14  ;;  %v68_v29 = vld [vmem:[%s1979_s0 + $0x18] sm:$0xff]  ;;  %v1726_v31 = vpack.c.bf16 %v302_v28, %v300_v27  ;;  %v69_v34 = vld [vmem:[%s1979_s0 + $0x20] sm:$0xff]  ;;  %v1736_v35 = vpack.c.bf16 %v301_v33, %v299_v32  ;;  %v70_v36 = vld [vmem:[%s1979_s0 + $0x28] sm:$0xff]  ;;  %p1564_p6 = pnand %p1563_p5, %p1557_p2 }
  0x30   :  { %1282 = vmatprep.subr.bf16.mxu1 %v1706_v19  ;;  %v71_v37 = vld [vmem:[%s1979_s0 + $0x30] sm:$0xff]  ;;  %v72_v38 = vld [vmem:[%s1979_s0 + $0x38] sm:$0xff]  ;;  %v77_v42 = vld [vmem:[%s1982_s3] sm:$0x3]  ;;  %s1591_s3 = smov 64  }
  0x31   :  { %1300 = vmatpush1.bf16.msra.mxu0 %v1709_v21  ;;  %v1764_v44 = vrot.slane %v77_v42, %v81_v41  ;;  %v1766_v45 = vrot.slane %v77_v42, %v85_v43  ;;  %v243_v50 = vld [vmem:[%s1983_s4] sm:$0x3] }
  0x32   :  { %1177 = vmatmul.mubr.msk.f32.gmra.mrb[2].mxu1 %vm89_vm0, %v66_v13  ;;  %1302 = vmatprep.subr.bf16.mxu0 %v1713_v24  ;;  %v244_v51 = vld [vmem:[%s1984_s5] sm:$0x3]  ;;  %v1776_v52 = vrot.slane %v243_v50, %v81_v41  ;;  %v1778_v53 = vrot.slane %v243_v50, %v85_v43 }
  0x33   :  { %190 = vmatprep.mubr.f32.mxu1 %v1590_v0  ;;  %1284 = vmatpush1.bf16.msra.mxu1 %v1709_v21  ;;  %v1780_v54 = vrot.slane %v244_v51, %v81_v41  ;;  %v1782_v56 = vrot.slane %v244_v51, %v85_v43 }
  0x34   :  { %1286 = vmatprep.subr.bf16.mxu1 %v1713_v24 }
  0x35   :  { %1304 = vmatpush1.bf16.msra.mxu0 %v1723_v30 }
  0x36   :  { %1178 = vmatmul.mubr.msk.f32.gmra.mrb[4].mxu1 %vm89_vm0, %v67_v18  ;;  %1306 = vmatprep.subr.bf16.mxu0 %v1726_v31 }
  0x37   :  { %196 = vmatprep.mubr.f32.mxu1 %v1590_v0  ;;  %1288 = vmatpush1.bf16.msra.mxu1 %v1723_v30 }
  0x38   :  { %1290 = vmatprep.subr.bf16.mxu1 %v1726_v31 }
  0x39   :  { %1308 = vmatpush1.bf16.msra.mxu0 %v1736_v35 }
  0x3a   :  { %1179 = vmatmul.mubr.msk.f32.gmra.mrb[6].mxu1 %vm89_vm0, %v68_v29  ;;  %1310 = vmatprep.subr.bf16.mxu0 %v1693_v11 }
  0x3b   :  { %202 = vmatprep.mubr.f32.mxu1 %v1590_v0  ;;  %1292 = vmatpush1.bf16.msra.mxu1 %v1736_v35 }
  0x3e   :  { %1180 = vmatmul.mubr.msk.f32.gmra.mrb[8].mxu1 %vm89_vm0, %v69_v34 }
  0x3f   :  { %208 = vmatprep.mubr.f32.mxu1 %v1590_v0 }
  0x42   :  { %1181 = vmatmul.mubr.msk.f32.gmra.mrb[10].mxu1 %vm89_vm0, %v70_v36 }
  0x43   :  { %214 = vmatprep.mubr.f32.mxu1 %v1590_v0 }
  0x46   :  { %1182 = vmatmul.mubr.msk.f32.gmra.mrb[12].mxu1 %vm89_vm0, %v71_v37 }
  0x47   :  { %220 = vmatprep.mubr.f32.mxu1 %v1590_v0 }
  0x4a   :  { %1183 = vmatmul.mubr.msk.f32.gmra.mrb[14].mxu1 %vm89_vm0, %v72_v38 }
  0x4b   :  { %371 = vmatprep.mubr.f32.mxu1 %v1590_v0 }
 0x101   :  { %v180_v46 = vpop.f32.mrb[0].mxu1 }
 0x102   :  { %v181_v47 = vadd.f32 %v180_v46, %v1764_v44  ;;  %v182_v48 = vpop.f32.mrb[1].mxu1 }
 0x103   :  { %v183_v49 = vadd.f32 %v182_v48, %v1766_v45 }
 0x104   :  { %1464 = vtanh.f32 %v181_v47 }
 0x105   :  { %1466 = vtanh.f32 %v183_v49 }
 0x109   :  { %v192_v1 = vpop.f32.mrb[4].mxu1 }
 0x10a   :  { %v194_v2 = vpop.f32.mrb[5].mxu1  ;;  %v193_v40 = vadd.f32 %v192_v1, %v1764_v44 }
 0x10b   :  { %v195_v41 = vadd.f32 %v194_v2, %v1766_v45 }
 0x10d   :  { %v1790_v3 = vpop.f32.mrb[6].mxu1 }
 0x10e   :  { %v1465_v55 = vpop.eup %1464  ;;  %v1792_v4 = vpop.f32.mrb[7].mxu1  ;;  %v199_v1 = vadd.f32 %v1790_v3, %v1764_v44 }
 0x10f   :  { %v1467_v57 = vpop.eup %1466  ;;  %v260_v58 = vmul.f32 %v1465_v55, %v1776_v52  ;;  %v201_v2 = vadd.f32 %v1792_v4, %v1766_v45 }
 0x110   :  { %v261_v59 = vmul.f32 %v1467_v57, %v1778_v53 }
 0x111   :  { %v273_v60 = vadd.f32 %v1780_v54, %v260_v58  ;;  %v1794_v5 = vpop.f32.mrb[8].mxu1 }
 0x112   :  { %v274_v61 = vadd.f32 %v1782_v56, %v261_v59  ;;  %v1796_v6 = vpop.f32.mrb[9].mxu1 }
 0x114   :  { %v275_v62 = vmul.f32 %v274_v61, %v273_v60 }
 0x115   :  { %v1798_v7 = vpop.f32.mrb[10].mxu1 }
 0x116   :  { %1468 = vtanh.f32 %v275_v62  ;;  %v1800_v8 = vpop.f32.mrb[11].mxu1 }
 0x119   :  { %v1802_v9 = vpop.f32.mrb[12].mxu1 }
 0x11a   :  { %v1804_v10 = vpop.f32.mrb[13].mxu1 }
 0x11d   :  { %v1806_v12 = vpop.f32.mrb[14].mxu1 }
 0x11e   :  { %v1808_v15 = vpop.f32.mrb[15].mxu1 }
 0x120   :  { %v1469_v63 = vpop.eup %1468 }
 0x121   :  { %278 = vrot.lane.b32.xlu0 %v1469_v63, %s1591_s3 }
 0x125   :  { %387 = vrot.lane.b32.xlu0 %v275_v62, %s1591_s3 }
 0x193   :  { %v279_v13 = vpop.permute.xlu0 %278 }
 0x194   :  { %v281_v16 = vmul.f32 %v279_v13, %v274_v61 }
 0x196   :  { %1184 = vmatmul.mubr.msk.f32.vlgmr.msra.gmra.mrb[2].mxu1 %vm303_vm1, %v281_v16 }
 0x197   :  { %v388_v33 = vpop.permute.xlu0 %387  ;;  %1235 = vmatprep.mubr.msk.f32.mxu1 %vm1593_vm2, %v1590_v0 }
 0x269   :  { %v373_v17 = vpop.f32.mrb[2].mxu1 }
 0x26a   :  { %v1425_v18 = vadd.f32 %v373_v17, %v1764_v44  ;;  %v375_v20 = vpop.f32.mrb[3].mxu1 }
 0x26b   :  { %v1426_v22 = vadd.f32 %v375_v20, %v1766_v45 }
 0x26c   :  { %1470 = vtanh.f32 %v1425_v18 }
 0x26d   :  { %1472 = vtanh.f32 %v1426_v22 }
 0x276   :  { %v1471_v23 = vpop.eup %1470 }
 0x277   :  { %v1473_v25 = vpop.eup %1472  ;;  %v382_v26 = vmul.f32 %v1471_v23, %v1776_v52 }
 0x278   :  { %v383_v27 = vmul.f32 %v1473_v25, %v1778_v53 }
 0x279   :  { %v384_v28 = vadd.f32 %v382_v26, %v1780_v54 }
 0x27a   :  { %v385_v29 = vadd.f32 %v383_v27, %v1782_v56 }
 0x27b   :  { %v390_v34 = vmul.f32 %v388_v33, %v384_v28 }
 0x27c   :  { %v391_v32 = vmul.f32 %v385_v29, %v384_v28 }
 0x27e   :  { %393 = vrot.lane.b32.xlu1 %v391_v32, %s1591_s3 }
 0x2f0   :  { %v394_v36 = vpop.permute.xlu1 %393 }
 0x2f1   :  { %v396_v37 = vadd.f32 %v394_v36, %v390_v34  ;;  %v205_v34 = vadd.f32 %v1794_v5, %v1764_v44  ;;  %v207_v36 = vadd.f32 %v1796_v6, %v1766_v45 }
 0x2f3   :  { %1474 = vtanh.f32 %v396_v37 }
 0x2fd   :  { %v1475_v38 = vpop.eup %1474 }
 0x2fe   :  { %v398_v39 = vmul.f32 %v1475_v38, %v385_v29 }
 0x300   :  { %1185 = vmatmul.mubr.msk.f32.vlgmr.msra.gmra.mrb[0].mxu0 %vm303_vm1, %v398_v39 }
 0x301   :  { %1312 = vmatpush1.bf16.msra.mxu0 %v1698_v14  ;;  %567 = vmatprep.mubr.f32.mxu0 %v1590_v0 }
 0x302   :  { %1314 = vmatprep.subr.bf16.mxu0 %v1706_v19 }
 0x305   :  { %1316 = vmatpush1.bf16.msra.mxu0 %v1709_v21 }
 0x306   :  { %1318 = vmatprep.subr.bf16.mxu0 %v1713_v24 }
 0x309   :  { %1320 = vmatpush1.bf16.msra.mxu0 %v1723_v30 }
 0x30a   :  { %1322 = vmatprep.subr.bf16.mxu0 %v1726_v31 }
 0x30d   :  { %1324 = vmatpush1.bf16.msra.mxu0 %v1736_v35 }
 0x30e   :  { %1326 = vmatprep.subr.bf16.mxu0 %v1693_v11 }
 0x3d3   :  { %v473_v42 = vpop.f32.mrb[0].mxu0 }
 0x3d4   :  { %v478_v43 = vadd.f32 %v473_v42, %v193_v40  ;;  %v475_v46 = vpop.f32.mrb[1].mxu0 }
 0x3d5   :  { %v479_v47 = vadd.f32 %v475_v46, %v195_v41 }
 0x3d6   :  { %1476 = vtanh.f32 %v478_v43 }
 0x3d7   :  { %1478 = vtanh.f32 %v479_v47 }
 0x3e0   :  { %v1477_v48 = vpop.eup %1476 }
 0x3e1   :  { %v1479_v49 = vpop.eup %1478  ;;  %v482_v50 = vmul.f32 %v1477_v48, %v1776_v52 }
 0x3e2   :  { %v483_v51 = vmul.f32 %v1479_v49, %v1778_v53 }
 0x3e3   :  { %v484_v55 = vadd.f32 %v482_v50, %v1780_v54 }
 0x3e4   :  { %v485_v57 = vadd.f32 %v483_v51, %v1782_v56 }
 0x3e5   :  { %v486_v59 = vmul.f32 %v484_v55, %v396_v37 }
 0x3e6   :  { %v487_v58 = vmul.f32 %v485_v57, %v484_v55 }
 0x3e8   :  { %489 = vrot.lane.b32.xlu1 %v487_v58, %s1591_s3  ;;  %v213_v58 = vadd.f32 %v1800_v8, %v1766_v45 }
 0x45a   :  { %v490_v60 = vpop.permute.xlu1 %489 }
 0x45b   :  { %v492_v61 = vadd.f32 %v490_v60, %v486_v59 }
 0x45d   :  { %1480 = vtanh.f32 %v492_v61 }
 0x467   :  { %v1481_v62 = vpop.eup %1480 }
 0x468   :  { %v494_v63 = vmul.f32 %v1481_v62, %v485_v57  ;;  %v211_v57 = vadd.f32 %v1798_v7, %v1764_v44 }
 0x46a   :  { %1186 = vmatmul.mubr.msk.f32.vlgmr.msra.gmra.mrb[2].mxu0 %vm303_vm1, %v494_v63 }
 0x46b   :  { %1328 = vmatpush1.bf16.msra.mxu0 %v1698_v14  ;;  %663 = vmatprep.mubr.f32.mxu0 %v1590_v0 }
 0x46c   :  { %1330 = vmatprep.subr.bf16.mxu0 %v1706_v19 }
 0x46f   :  { %1332 = vmatpush1.bf16.msra.mxu0 %v1709_v21 }
 0x470   :  { %1334 = vmatprep.subr.bf16.mxu0 %v1713_v24 }
 0x473   :  { %1336 = vmatpush1.bf16.msra.mxu0 %v1723_v30 }
 0x474   :  { %1338 = vmatprep.subr.bf16.mxu0 %v1726_v31 }
 0x477   :  { %1340 = vmatpush1.bf16.msra.mxu0 %v1736_v35 }
 0x478   :  { %1342 = vmatprep.subr.bf16.mxu0 %v1693_v11 }
 0x53d   :  { %v569_v13 = vpop.f32.mrb[2].mxu0 }
 0x53e   :  { %v574_v16 = vadd.f32 %v569_v13, %v199_v1  ;;  %v571_v17 = vpop.f32.mrb[3].mxu0 }
 0x53f   :  { %v575_v18 = vadd.f32 %v571_v17, %v201_v2 }
 0x540   :  { %1482 = vtanh.f32 %v574_v16 }
 0x541   :  { %1484 = vtanh.f32 %v575_v18 }
 0x54a   :  { %v1483_v20 = vpop.eup %1482 }
 0x54b   :  { %v1485_v22 = vpop.eup %1484  ;;  %v578_v23 = vmul.f32 %v1483_v20, %v1776_v52 }
 0x54c   :  { %v579_v25 = vmul.f32 %v1485_v22, %v1778_v53 }
 0x54d   :  { %v580_v26 = vadd.f32 %v578_v23, %v1780_v54  ;;  %v217_v23 = vadd.f32 %v1802_v9, %v1764_v44 }
 0x54e   :  { %v581_v27 = vadd.f32 %v579_v25, %v1782_v56 }
 0x54f   :  { %v582_v4 = vmul.f32 %v580_v26, %v492_v61 }
 0x550   :  { %v583_v3 = vmul.f32 %v581_v27, %v580_v26 }
 0x552   :  { %585 = vrot.lane.b32.xlu0 %v583_v3, %s1591_s3 }
 0x5c4   :  { %v586_v28 = vpop.permute.xlu0 %585 }
 0x5c5   :  { %v588_v29 = vadd.f32 %v586_v28, %v582_v4 }
 0x5c7   :  { %1486 = vtanh.f32 %v588_v29 }
 0x5d1   :  { %v1487_v32 = vpop.eup %1486 }
 0x5d2   :  { %v590_v33 = vmul.f32 %v1487_v32, %v581_v27 }
 0x5d4   :  { %1187 = vmatmul.mubr.msk.f32.vlgmr.msra.gmra.mrb[4].mxu0 %vm303_vm1, %v590_v33  ;;  %v1592_v33 = vmov 0.0|0.0  }
 0x5d5   :  { %1344 = vmatpush1.bf16.msra.mxu0 %v1698_v14  ;;  %759 = vmatprep.mubr.f32.mxu0 %v1590_v0 }
 0x5d6   :  { %1346 = vmatprep.subr.bf16.mxu0 %v1706_v19  ;;  %1389 = vmatprep.subr.bf16.mxu1 %v1592_v33 }
 0x5d9   :  { %1348 = vmatpush1.bf16.msra.mxu0 %v1709_v21 }
 0x5da   :  { %1350 = vmatprep.subr.bf16.mxu0 %v1713_v24 }
 0x5dd   :  { %1352 = vmatpush1.bf16.msra.mxu0 %v1723_v30 }
 0x5de   :  { %1354 = vmatprep.subr.bf16.mxu0 %v1726_v31 }
 0x5e1   :  { %1356 = vmatpush1.bf16.msra.mxu0 %v1736_v35 }
 0x5e2   :  { %1358 = vmatprep.subr.bf16.mxu0 %v1693_v11 }
 0x6a7   :  { %v665_v37 = vpop.f32.mrb[4].mxu0 }
 0x6a8   :  { %v670_v38 = vadd.f32 %v665_v37, %v205_v34  ;;  %v667_v39 = vpop.f32.mrb[5].mxu0  ;;  %v223_v34 = vadd.f32 %v1806_v12, %v1764_v44  ;;  %v977_v44 = vld [vmem:[%s1985_s6 + $0x10] sm:$0xff] }
 0x6a9   :  { %v671_v40 = vadd.f32 %v667_v39, %v207_v36  ;;  %v225_v36 = vadd.f32 %v1808_v15, %v1766_v45  ;;  %v979_v15 = vld [vmem:[%s1985_s6 + $0x20] sm:$0xff] }
 0x6aa   :  { %1488 = vtanh.f32 %v670_v38 }
 0x6ab   :  { %1490 = vtanh.f32 %v671_v40 }
 0x6b4   :  { %v1489_v41 = vpop.eup %1488 }
 0x6b5   :  { %v1491_v42 = vpop.eup %1490  ;;  %v674_v43 = vmul.f32 %v1489_v41, %v1776_v52  ;;  %v975_v41 = vld [vmem:[%s1985_s6] sm:$0xff] }
 0x6b6   :  { %v675_v46 = vmul.f32 %v1491_v42, %v1778_v53  ;;  %v976_v42 = vld [vmem:[%s1985_s6 + $0x8] sm:$0xff] }
 0x6b7   :  { %v676_v47 = vadd.f32 %v674_v43, %v1780_v54  ;;  %v1390_v43 = vpack.c.bf16 %v976_v42, %v975_v41 }
 0x6b8   :  { %v677_v48 = vadd.f32 %v675_v46, %v1782_v56  ;;  %v980_v46 = vld [vmem:[%s1985_s6 + $0x28] sm:$0xff] }
 0x6b9   :  { %v678_v6 = vmul.f32 %v676_v47, %v588_v29  ;;  %1391 = vmatpush3.bf16.msra.mxu1 %v1390_v43 }
 0x6ba   :  { %v679_v5 = vmul.f32 %v677_v48, %v676_v47  ;;  %1392 = vmatprep.subr.bf16.mxu1 %v1592_v33  ;;  %v1396_v47 = vpack.c.bf16 %v980_v46, %v979_v15 }
 0x6bc   :  { %681 = vrot.lane.b32.xlu1 %v679_v5, %s1591_s3  ;;  %v981_v5 = vld [vmem:[%s1985_s6 + $0x30] sm:$0xff] }
 0x72e   :  { %v682_v49 = vpop.permute.xlu1 %681 }
 0x72f   :  { %v684_v50 = vadd.f32 %v682_v49, %v678_v6  ;;  %v982_v6 = vld [vmem:[%s1985_s6 + $0x38] sm:$0xff] }
 0x731   :  { %1492 = vtanh.f32 %v684_v50 }
 0x73b   :  { %v1493_v51 = vpop.eup %1492 }
 0x73c   :  { %v686_v55 = vmul.f32 %v1493_v51, %v677_v48 }
 0x73e   :  { %1188 = vmatmul.mubr.msk.f32.vlgmr.msra.gmra.mrb[6].mxu0 %vm303_vm1, %v686_v55 }
 0x73f   :  { %1360 = vmatpush1.bf16.msra.mxu0 %v1698_v14  ;;  %855 = vmatprep.mubr.f32.mxu0 %v1590_v0 }
 0x740   :  { %1362 = vmatprep.subr.bf16.mxu0 %v1706_v19 }
 0x743   :  { %1364 = vmatpush1.bf16.msra.mxu0 %v1709_v21 }
 0x744   :  { %1366 = vmatprep.subr.bf16.mxu0 %v1713_v24 }
 0x747   :  { %1368 = vmatpush1.bf16.msra.mxu0 %v1723_v30 }
 0x748   :  { %1370 = vmatprep.subr.bf16.mxu0 %v1726_v31 }
 0x74b   :  { %1372 = vmatpush1.bf16.msra.mxu0 %v1736_v35 }
 0x74c   :  { %1374 = vmatprep.subr.bf16.mxu0 %v1693_v11 }
 0x811   :  { %v761_v59 = vpop.f32.mrb[6].mxu0 }
 0x812   :  { %v766_v60 = vadd.f32 %v761_v59, %v211_v57  ;;  %v763_v61 = vpop.f32.mrb[7].mxu0  ;;  %v1399_v57 = vpack.c.bf16 %v982_v6, %v981_v5 }
 0x813   :  { %v767_v62 = vadd.f32 %v763_v61, %v213_v58 }
 0x814   :  { %1494 = vtanh.f32 %v766_v60 }
 0x815   :  { %1496 = vtanh.f32 %v767_v62 }
 0x81e   :  { %v1495_v63 = vpop.eup %1494 }
 0x81f   :  { %v1497_v1 = vpop.eup %1496  ;;  %v770_v2 = vmul.f32 %v1495_v63, %v1776_v52 }
 0x820   :  { %v771_v13 = vmul.f32 %v1497_v1, %v1778_v53 }
 0x821   :  { %v772_v11 = vadd.f32 %v770_v2, %v1780_v54  ;;  %v1066_v2 = vld [vmem:[#allocation7 + $0x10] sm:$0xff] }
 0x822   :  { %v773_v16 = vadd.f32 %v771_v13, %v1782_v56  ;;  %v1067_v13 = vld [vmem:[#allocation7 + $0x18] sm:$0xff] }
 0x823   :  { %v774_v8 = vmul.f32 %v772_v11, %v684_v50 }
 0x824   :  { %v775_v7 = vmul.f32 %v773_v16, %v772_v11  ;;  %v1068_v11 = vld [vmem:[#allocation7 + $0x20] sm:$0xff] }
 0x826   :  { %777 = vrot.lane.b32.xlu0 %v775_v7, %s1591_s3 }
 0x898   :  { %v778_v17 = vpop.permute.xlu0 %777 }
 0x899   :  { %v780_v18 = vadd.f32 %v778_v17, %v774_v8  ;;  %v1070_v8 = vld [vmem:[#allocation7 + $0x30] sm:$0xff]  ;;  %v1071_v17 = vld [vmem:[#allocation7 + $0x38] sm:$0xff] }
 0x89b   :  { %1498 = vtanh.f32 %v780_v18 }
 0x8a5   :  { %v1499_v20 = vpop.eup %1498 }
 0x8a6   :  { %v782_v22 = vmul.f32 %v1499_v20, %v773_v16  ;;  %v1069_v16 = vld [vmem:[#allocation7 + $0x28] sm:$0xff]  ;;  %v1072_v20 = vld [vmem:[#allocation7 + $0x40] sm:$0xff] }
 0x8a7   :  { %v1408_v7 = vpack.c.bf16 %v1069_v16, %v1068_v11 }
 0x8a8   :  { %1189 = vmatmul.mubr.msk.f32.vlgmr.msra.gmra.mrb[8].mxu0 %vm303_vm1, %v782_v22  ;;  %v1073_v22 = vld [vmem:[#allocation7 + $0x48] sm:$0xff] }
 0x8a9   :  { %1376 = vmatpush1.bf16.msra.mxu0 %v1698_v14  ;;  %951 = vmatprep.mubr.f32.mxu0 %v1590_v0  ;;  %v219_v14 = vadd.f32 %v1804_v10, %v1766_v45  ;;  %v978_v45 = vld [vmem:[%s1985_s6 + $0x18] sm:$0xff] }
 0x8aa   :  { %1378 = vmatprep.subr.bf16.mxu0 %v1706_v19  ;;  %v1393_v12 = vpack.c.bf16 %v978_v45, %v977_v44 }
 0x8ac   :  { %1394 = vmatpush3.bf16.msra.mxu1 %v1393_v12 }
 0x8ad   :  { %1380 = vmatpush1.bf16.msra.mxu0 %v1709_v21  ;;  %1395 = vmatprep.subr.bf16.mxu1 %v1592_v33 }
 0x8ae   :  { %1382 = vmatprep.subr.bf16.mxu0 %v1713_v24 }
 0x8b0   :  { %1397 = vmatpush3.bf16.msra.mxu1 %v1396_v47 }
 0x8b1   :  { %1384 = vmatpush1.bf16.msra.mxu0 %v1723_v30  ;;  %1398 = vmatprep.subr.bf16.mxu1 %v1592_v33 }
 0x8b2   :  { %1386 = vmatprep.subr.bf16.mxu0 %v1726_v31 }
 0x8b4   :  { %1400 = vmatpush3.bf16.msra.mxu1 %v1399_v57 }
 0x8b5   :  { %1388 = vmatpush1.bf16.msra.mxu0 %v1736_v35  ;;  %1401 = vmatprep.subr.bf16.mxu1 %v1592_v33 }
 0x97b   :  { %v857_v25 = vpop.f32.mrb[8].mxu0 }
 0x97c   :  { %v862_v26 = vadd.f32 %v857_v25, %v217_v23  ;;  %v859_v27 = vpop.f32.mrb[9].mxu0  ;;  %v1414_v23 = vpack.c.bf16 %v1073_v22, %v1072_v20 }
 0x97d   :  { %v863_v19 = vadd.f32 %v859_v27, %v219_v14  ;;  %v1075_v14 = vld [vmem:[#allocation7 + $0x58] sm:$0xff]  ;;  %v1077_v27 = vld [vmem:[#allocation7 + $0x68] sm:$0xff] }
 0x97e   :  { %1500 = vtanh.f32 %v862_v26  ;;  %v1076_v26 = vld [vmem:[#allocation7 + $0x60] sm:$0xff] }
 0x97f   :  { %1502 = vtanh.f32 %v863_v19  ;;  %v1420_v19 = vpack.c.bf16 %v1077_v27, %v1076_v26 }
 0x988   :  { %v1501_v21 = vpop.eup %1500 }
 0x989   :  { %v1503_v24 = vpop.eup %1502  ;;  %v866_v30 = vmul.f32 %v1501_v21, %v1776_v52  ;;  %v1078_v21 = vld [vmem:[#allocation7 + $0x70] sm:$0xff] }
 0x98a   :  { %v867_v31 = vmul.f32 %v1503_v24, %v1778_v53  ;;  %v1079_v24 = vld [vmem:[#allocation7 + $0x78] sm:$0xff] }
 0x98b   :  { %v868_v35 = vadd.f32 %v866_v30, %v1780_v54  ;;  %v1423_v30 = vpack.c.bf16 %v1079_v24, %v1078_v21 }
 0x98c   :  { %v869_v3 = vadd.f32 %v867_v31, %v1782_v56  ;;  %v1191_v31 = vld [vmem:[%s1986_s7] ss:$0 sm:$0xff] }
 0x98d   :  { %v870_v10 = vmul.f32 %v868_v35, %v780_v18  ;;  %v1411_v18 = vpack.c.bf16 %v1071_v17, %v1070_v8 }
 0x98e   :  { %v871_v9 = vmul.f32 %v869_v3, %v868_v35 }
 0x990   :  { %873 = vrot.lane.b32.xlu1 %v871_v9, %s1591_s3 }
 0xa02   :  { %v874_v4 = vpop.permute.xlu1 %873 }
 0xa03   :  { %v876_v28 = vadd.f32 %v874_v4, %v870_v10  ;;  %v1081_v4 = vstv %s1988_s9 }
 0xa05   :  { %1504 = vtanh.f32 %v876_v28 }
 0xa0f   :  { %v1505_v29 = vpop.eup %1504 }
 0xa10   :  { %v878_v32 = vmul.f32 %v1505_v29, %v869_v3 }
 0xa12   :  { %1190 = vmatmul.mubr.msk.f32.vlgmr.msra.gmra.mrb[10].mxu0 %vm303_vm1, %v878_v32 }
 0xae5   :  { %v953_v37 = vpop.f32.mrb[10].mxu0 }
 0xae6   :  { %v958_v38 = vadd.f32 %v953_v37, %v223_v34  ;;  %v955_v39 = vpop.f32.mrb[11].mxu0 }
 0xae7   :  { %v959_v40 = vadd.f32 %v955_v39, %v225_v36 }
 0xae8   :  { %1506 = vtanh.f32 %v958_v38 }
 0xae9   :  { %1508 = vtanh.f32 %v959_v40 }
 0xaf2   :  { %v1507_v48 = vpop.eup %1506 }
 0xaf3   :  { %v1509_v49 = vpop.eup %1508  ;;  %v962_v50 = vmul.f32 %v1507_v48, %v1776_v52  ;;  %v1064_v52 = vld [vmem:[#allocation7] sm:$0xff] }
 0xaf4   :  { %v963_v51 = vmul.f32 %v1509_v49, %v1778_v53  ;;  %v1065_v53 = vld [vmem:[#allocation7 + $0x8] sm:$0xff] }
 0xaf5   :  { %v964_v55 = vadd.f32 %v962_v50, %v1780_v54  ;;  %v1402_v54 = vpack.c.bf16 %v1065_v53, %v1064_v52 }
 0xaf6   :  { %v965_v58 = vadd.f32 %v963_v51, %v1782_v56  ;;  %v1405_v56 = vpack.c.bf16 %v1067_v13, %v1066_v2 }
 0xaf7   :  { %v966_v60 = vmul.f32 %v964_v55, %v876_v28 }
 0xaf8   :  { %v967_v59 = vmul.f32 %v965_v58, %v964_v55 }
 0xafa   :  { %969 = vrot.lane.b32.xlu0 %v967_v59, %s1591_s3 }
 0xb6c   :  { %v970_v61 = vpop.permute.xlu0 %969 }
 0xb6d   :  { %v972_v62 = vadd.f32 %v970_v61, %v966_v60 }
 0xb6f   :  { %1510 = vtanh.f32 %v972_v62 }
 0xb79   :  { %v1511_v63 = vpop.eup %1510 }
 0xb7a   :  { %v974_v1 = vmul.f32 %v1511_v63, %v965_v58 }
 0xb7c   :  { %1236 = vmatmul.mubr.msk.f32.vlgmr.msra.gmra.mrb[16].mxu1 %vm303_vm1, %v974_v1 }
 0xb7d   :  { %1403 = vmatpush3.bf16.msra.mxu1 %v1402_v54  ;;  %1270 = vmatprep.mubr.msk.f32.mxu1 %vm1593_vm2, %v1590_v0  ;;  %v1074_v0 = vld [vmem:[#allocation7 + $0x50] sm:$0xff] }
 0xb7e   :  { %1404 = vmatprep.subr.bf16.mxu1 %v1592_v33  ;;  %v1417_v25 = vpack.c.bf16 %v1075_v14, %v1074_v0 }
 0xb81   :  { %1406 = vmatpush3.bf16.msra.mxu1 %v1405_v56 }
 0xb82   :  { %1407 = vmatprep.subr.bf16.mxu1 %v1592_v33 }
 0xb85   :  { %1409 = vmatpush3.bf16.msra.mxu1 %v1408_v7 }
 0xb86   :  { %1410 = vmatprep.subr.bf16.mxu1 %v1592_v33 }
 0xb89   :  { %1412 = vmatpush3.bf16.msra.mxu1 %v1411_v18 }
 0xb8a   :  { %1413 = vmatprep.subr.bf16.mxu1 %v1592_v33 }
 0xb8d   :  { %1415 = vmatpush3.bf16.msra.mxu1 %v1414_v23 }
 0xb8e   :  { %1416 = vmatprep.subr.bf16.mxu1 %v1592_v33 }
 0xb91   :  { %1418 = vmatpush3.bf16.msra.mxu1 %v1417_v25 }
 0xb92   :  { %1419 = vmatprep.subr.bf16.mxu1 %v1592_v33 }
 0xb95   :  { %1421 = vmatpush3.bf16.msra.mxu1 %v1420_v19 }
 0xb96   :  { %1422 = vmatprep.subr.bf16.mxu1 %v1592_v33 }
 0xb99   :  { %1424 = vmatpush3.bf16.msra.mxu1 %v1423_v30 }
 0xc4f   :  { %v1059_v35 = vpop.f32.mrb[16].mxu1 }
 0xc50   :  { %v1060_v3 = vadd.f32 %v1191_v31, %v1059_v35  ;;  %v1237_v9 = vpop.f32.mrb[17].mxu1 }
 0xc52   :  { %v1063_v10 = vmax.f32 %v1060_v3, 0.0 }
 0xc54   :  { %1271 = vmatmul.mubr.f32.vlgmr.msra.gmra.mrb[18].mxu1 %v1063_v10 }
 0xd27   :  { %v1148_v28 = vpop.f32.mrb[18].mxu1 }
 0xd28   :  { %v1149_v29 = vadd.f32 %v1148_v28, %v1081_v4  ;;  %v1272_v32 = vpop.f32.mrb[19].mxu1 }
 0xd2a   :  { %1152 = vst [vmem:[#allocation9] sm:$0xff] %v1149_v29 }
 0xd2b   :  { %1567 = shalt.err (!%p1564_p6)
}
 0xd2c   :  { %s1568_s23 = scalar_lea.hbm %s1989_s10, 128 }
 0xd2d   :  { %p1569_p7 = scmp.ne.s32.totalorder %s1989_s10, %s1568_s23  ;;  %p1572_p8 = scmp.lt.u32.totalorder %s1568_s23, %s1989_s10 }
 0xd2f   :  { %p1574_p9 = pnand %p1572_p8, %p1569_p7 }
 0xd31   :  { %1577 = shalt.err (!%p1574_p9)
}
 0xd32   :  { %1162 = dma.vmem_to_hbm [thread:$0]  %s1160_s21, 128, %s1989_s10, [#allocation6]  }
 0xd33   :  { %1582 = dma.done.wait [#allocation6], 128  }
 0xd34   :  { %1583 = vsyncadd [#allocation6], 4294967168 }
 0xd35   :  { %1166 = vsyncpa [#allocation5], 1 }
 0xd36   :  { %1167 = vsyncpa [#allocation8], 1 }
 0xd37   :  { %1168 = vsyncpa [#allocation6], 1 }

</bundles_post_ra>
